<compile_context>
chip_gen: v7x
topology: tpu7x:2x2x1
jax: 0.10.0
libtpu: 0.0.40
codegen_flags: <defaults>
</compile_context>

<pallas_src>
import math

import jax
import jax.numpy as jnp
from jax.experimental import pallas as pl
from jax.experimental.pallas import tpu as pltpu


def _pe_add_kernel(x_ref, pe_ref, o_ref):
    # Elementwise hot path: x + (pe + learn_pos), constant table broadcast over batch.
    o_ref[...] = x_ref[...] + pe_ref[...][None]


def _tpu_generation_params():
    """Return (physical VMEM bytes per TC, TensorCores per chip, block budget bytes)."""
    kind = ""
    try:
        kind = jax.devices()[0].device_kind.lower()
    except Exception:
        pass
    if "v7" in kind or "7x" in kind:
        return 64 << 20, 2, 6 << 20   # v7x: 64 MiB VMEM/TC, 2 TCs, ~6 MiB blocks
    if "v6" in kind or "6e" in kind:
        return 128 << 20, 1, 8 << 20  # v6e: large VMEM, single TC, ~8 MiB blocks
    if "v5" in kind:
        return 128 << 20, 1, 4 << 20  # v5e: ~820 GB/s HBM -> 4 MiB already near roofline
    return 64 << 20, 2, 4 << 20       # unknown chip: conservative (v7x-like)


def _sublane_multiple(dtype):
    # Sublane packing: 8 rows for 32-bit dtypes, 16 for bf16, 32 for int8/fp8.
    return max(8, 32 // jnp.dtype(dtype).itemsize)


def _pick_tiles(B, S, C, dtype, budget_bytes, n_cores):
    """Pick (tile_b, tile_s): largest sublane-aligned blocks within the budget
    (amortizes ~0.35 us/step pipeline overhead), with >= n_cores grid steps."""
    itemsize = jnp.dtype(dtype).itemsize
    sub = _sublane_multiple(dtype)
    row_bytes = C * itemsize

    # Largest sublane-aligned row count per block that fits the budget.
    max_rows = max(sub, (budget_bytes // max(row_bytes, 1)) // sub * sub)
    tile_s = S if S <= max_rows else max_rows

    # If the whole S fits in one block, pack several batch rows per block.
    tile_b = 1
    if tile_s == S:
        tile_b = int(min(B, max(1, budget_bytes // max(S * row_bytes, 1))))

    # Guarantee >= n_cores grid steps so all TensorCores get work (v7x only).
    if n_cores > 1:
        def _steps(tb, ts):
            return pl.cdiv(B, tb) * pl.cdiv(S, ts)
        if _steps(tile_b, tile_s) < n_cores and tile_b > 1:
            tile_b = max(1, pl.cdiv(B, n_cores))
        if _steps(tile_b, tile_s) < n_cores and tile_s >= 2 * sub:
            tile_s = max(sub, pl.cdiv(pl.cdiv(S, n_cores), sub) * sub)
    return tile_b, tile_s


def positional_encoding_forward(x, combined_flat, *, block_budget_bytes=None):
    """x: (B, S, C); combined_flat: (S, C) = pe + learn_pos (frozen / inference).

    Returns x + combined_flat broadcast over batch.
    """
    B, S, C = x.shape
    assert combined_flat.shape == (S, C)
    combined_flat = combined_flat.astype(x.dtype)
    itemsize = jnp.dtype(x.dtype).itemsize

    phys_vmem, n_cores, default_budget = _tpu_generation_params()
    budget = block_budget_bytes if block_budget_bytes is not None else default_budget

    tile_b, tile_s = _pick_tiles(B, S, C, x.dtype, budget, n_cores)
    grid = (pl.cdiv(S, tile_s), pl.cdiv(B, tile_b))  # S outer (slow), B inner (fast)

    # Footprint: x + out blocks double-buffered, plus the (small) pe block.
    vmem_need = (4 * tile_b + 2) * tile_s * C * itemsize
    vmem_limit = int(min(phys_vmem, max(vmem_need + (8 << 20), 32 << 20)))

    cost = pl.CostEstimate(
        flops=B * S * C,
        transcendentals=0,
        bytes_accessed=(2 * B * S * C + S * C) * itemsize,
    )

    return pl.pallas_call(
        _pe_add_kernel,
        out_shape=jax.ShapeDtypeStruct((B, S, C), x.dtype),
        grid_spec=pl.GridSpec(
            grid=grid,
            in_specs=[
                pl.BlockSpec((tile_b, tile_s, C), lambda s, b: (b, s, 0)),
                # pe block index depends only on the outer (slow) grid axis, so it
                # stays VMEM-resident across the whole inner batch loop: total pe
                # traffic is exactly S*C bytes.
                pl.BlockSpec((tile_s, C), lambda s, b: (s, 0)),
            ],
            out_specs=pl.BlockSpec((tile_b, tile_s, C), lambda s, b: (b, s, 0)),
        ),
        compiler_params=pltpu.CompilerParams(
            dimension_semantics=("parallel", "parallel"),
            vmem_limit_bytes=vmem_limit,
        ),
        cost_estimate=cost,
    )(x, combined_flat)


def make_sinusoidal_pe(n_frames, num_joints, n_levels, dim_img, dtype=jnp.float32):
    """Reproduce the PyTorch buffer `pe` of shape (1, T, P, L, C)."""
    assert dim_img % 2 == 0, "dim_img must be even (matches the PyTorch construction)"
    position = jnp.arange(n_frames, dtype=jnp.float32)[:, None]              # (T, 1)
    div_term = jnp.exp(
        jnp.arange(0, dim_img, 2, dtype=jnp.float32) * (-math.log(10000.0) / dim_img)
    )                                                                         # (C/2,)
    angles = position * div_term                                              # (T, C/2)
    pe = jnp.zeros((1, n_frames, num_joints, n_levels, dim_img), dtype=jnp.float32)
    sin = jnp.sin(angles)[None, :, None, None, :]                             # (1,T,1,1,C/2)
    cos = jnp.cos(angles)[None, :, None, None, :]
    pe = pe.at[..., 0::2].set(jnp.broadcast_to(sin, pe[..., 0::2].shape))
    pe = pe.at[..., 1::2].set(jnp.broadcast_to(cos, pe[..., 1::2].shape))
    return pe.astype(dtype)


class PositionalEncodingPallas:
    def __init__(self, num_joints=4, n_frames=8, n_levels=4, dim_img=128, dropout=0.0):
        self.num_joints = num_joints
        self.n_frames = n_frames
        self.n_levels = n_levels
        self.dim_img = dim_img
        self.dropout_p = dropout  # p=0 in the reference -> identity at inference
        # TODO(synk): dropout with p>0 (stateful RNG masking) not implemented; p=0 is identity.

        # Buffer `pe` (deterministic sinusoidal) and parameter `learn_pos`
        # (zeros, exactly as in the PyTorch module).
        self.pe = make_sinusoidal_pe(n_frames, num_joints, n_levels, dim_img)
        self.learn_pos = jnp.zeros(
            (1, n_frames, num_joints, n_levels, dim_img), dtype=jnp.float32
        )

        S = n_frames * num_joints * n_levels
        # Inference-time fusion: pe and learn_pos are both constants in this forward,
        # so pre-sum them once -> one DMA stream and one VPU add per tile.
        # (Keep them separate if gradients through learn_pos are ever needed.)
        self._combined_flat = (self.pe + self.learn_pos).reshape(S, dim_img)

    def __call__(self, x):
        # x: (B, T*P*L, C) -- semantics of:
        #   rearrange b (t p l) c -> b t p l c ; add pe + learn_pos ; rearrange back
        # pe/learn_pos are flattened in the same (t p l) order, so the add happens
        # directly on the flattened layout.
        B, S, C = x.shape
        assert S == self.n_frames * self.num_joints * self.n_levels
        assert C == self.dim_img
        return positional_encoding_forward(x, self._combined_flat)


if __name__ == "__main__":
    # Small shapes consistent with the module's forward.
    B = 2
    n_frames, num_joints, n_levels, dim_img = 8, 4, 4, 128
    S = n_frames * num_joints * n_levels  # 128

    key = jax.random.PRNGKey(0)
    x = jax.random.normal(key, (B, S, dim_img), dtype=jnp.float32)

    module = PositionalEncodingPallas(
        num_joints=num_joints, n_frames=n_frames, n_levels=n_levels,
        dim_img=dim_img, dropout=0.0,
    )

    # Reference (plain JAX, same semantics as the PyTorch forward).
    x5 = x.reshape(B, n_frames, num_joints, n_levels, dim_img)
    ref = (x5 + module.pe[:, :n_frames] + module.learn_pos).reshape(B, S, dim_img)
    ref = jax.block_until_ready(ref)

    out = module(x)
    out = jax.block_until_ready(out)

    assert out.shape == (B, S, dim_img)
    assert jnp.allclose(out, ref, atol=1e-5, rtol=1e-5)

    print("KERNEL_OK")
</pallas_src>

<mosaic_0001>
module attributes {stable_mosaic.version = 11 : i64} {
  func.func @_pe_add_kernel(%arg0: i32, %arg1: i32, %arg2: memref<1x128x128xf32, #tpu.memory_space<vmem>>, %arg3: memref<128x128xf32, #tpu.memory_space<vmem>>, %arg4: memref<1x128x128xf32, #tpu.memory_space<vmem>>) attributes {dimension_semantics = [#tpu.dimension_semantics<parallel>, #tpu.dimension_semantics<parallel>], iteration_bounds = array<i64: 1, 2>, scalar_prefetch = 0 : i64, scratch_operands = 0 : i64, tpu.core_type = #tpu.core_type<tc>, window_params = [{transform_indices = @transform_0, window_bounds = array<i64: 1, 128, 128>}, {transform_indices = @transform_1, window_bounds = array<i64: 128, 128>}, {transform_indices = @transform_2, window_bounds = array<i64: 1, 128, 128>}]} {
    %c0 = arith.constant 0 : index
    %c0_0 = arith.constant 0 : index
    %c0_1 = arith.constant 0 : index
    %0 = vector.load %arg2[%c0, %c0_0, %c0_1] : memref<1x128x128xf32, #tpu.memory_space<vmem>>, vector<1x128x128xf32>
    %c0_2 = arith.constant 0 : index
    %c0_3 = arith.constant 0 : index
    %1 = vector.load %arg3[%c0_2, %c0_3] : memref<128x128xf32, #tpu.memory_space<vmem>>, vector<128x128xf32>
    %2 = vector.shape_cast %1 : vector<128x128xf32> to vector<1x128x128xf32>
    %3 = arith.addf %0, %2 : vector<1x128x128xf32>
    %c0_4 = arith.constant 0 : index
    %c0_5 = arith.constant 0 : index
    %c0_6 = arith.constant 0 : index
    %4 = vector.load %arg4[%c0_4, %c0_5, %c0_6] : memref<1x128x128xf32, #tpu.memory_space<vmem>>, vector<1x128x128xf32>
    tpu.vector_store %arg4[%c0_4, %c0_5, %c0_6], %3 {strides = array<i32>} : memref<1x128x128xf32, #tpu.memory_space<vmem>>, vector<1x128x128xf32>,
    return
  }
  func.func @transform_0(%arg0: i32, %arg1: i32) -> (i32, i32, i32) {
    %c0_i32 = arith.constant 0 : i32
    %c0_i32_0 = arith.constant 0 : i32
    return %arg1, %arg0, %c0_i32 : i32, i32, i32
  }
  func.func @transform_1(%arg0: i32, %arg1: i32) -> (i32, i32) {
    %c0_i32 = arith.constant 0 : i32
    %c0_i32_0 = arith.constant 0 : i32
    return %arg0, %c0_i32 : i32, i32
  }
  func.func @transform_2(%arg0: i32, %arg1: i32) -> (i32, i32, i32) {
    %c0_i32 = arith.constant 0 : i32
    %c0_i32_0 = arith.constant 0 : i32
    return %arg1, %arg0, %c0_i32 : i32, i32, i32
  }
}

</mosaic_0001>

<bundles_post_ra>
// kernel: tpu_custom_call.1
= control target key start
LH: loop header
LB: loop body
LE: loop exit
PB: predicated region body
PF: predicated region fallthrough
CT: control target
= control target key end

     0   :  { %7 = vsyncpa [#allocation3], 0  ;;  %s911_s0 = inlined_call_operand.hbm [shape: f32[2,128,128], index: 0, kind: input, shape index: {}]   ;;  %s912_s1 = inlined_call_operand.hbm [shape: f32[128,128], index: 1, kind: input, shape index: {}]   ;;  %s913_s2 = inlined_call_operand.hbm [shape: f32[2,128,128], index: 2, kind: output, shape index: {}]  }
   0x1   :  { %9 = vsyncpa [#allocation3 + $0x1], 0 }
   0x2   :  { %10 = vsyncpa [#allocation6], 0 }
   0x3   :  { %11 = vsyncpa [#allocation4], 0 }
   0x4   :  { %13 = vsyncpa [#allocation4 + $0x1], 0  ;;  %s649_s9 = smov 0   ;;  %s651_s10 = smov 0  }
   0x5   :  { %s653_s11 = smov 0   ;;  %s655_s12 = smov 0  }
   0x6   :  { %s657_s13 = smov 0   ;;  %s659_s14 = smov 0  }
   0x7 LB: > { %s385_s15 = sadd.s32 4294967295, %s625_s14   ;;  %s386_s16 = sadd.s32 4294967294, %s625_s14   ;;  %s625_s14 = sphi %s659_s14, %s19_s14   ;;  %s621_s13 = sphi %s657_s13, %s937_s13   ;;  %s617_s12 = sphi %s655_s12, %s936_s12   ;;  %s613_s11 = sphi %s653_s11, %s935_s11   ;;  %s609_s10 = sphi %s651_s10, %s934_s10   ;;  %s605_s9 = sphi %s649_s9, %s933_s9  }
   0x8   : > { %p53_p0 = scmp.ne.s32.totalorder %s609_s10, %s605_s9  ;;  %p683_p1 = scmp.eq.s32.totalorder %s385_s15, 0 }
   0x9   : > { %p687_p2 = scmp.eq.s32.totalorder %s385_s15, 1  ;;  %p111_p3 = scmp.eq.s32.totalorder %s386_s16, 1 }
   0xa   : > { %s918_s17 = scalar_select %p683_p1, 1, 0 }
   0xb   : > { %s919_s18 = scalar_select %p687_p2, 1, 0 }
   0xc   : > { %p693_p4 = por %p683_p1, %p53_p0  ;;  %p387_p5 = scmp.ge.s32.totalorder %s625_s14, 1 }
   0xd   : > { %p698_p6 = por %p111_p3, %p53_p0  ;;  %p118_p7 = scmp.lt.s32.totalorder %s625_s14, 3 }
   0xe   : > { %s920_s19 = scalar_select %p693_p4, 1, 0 }
   0xf   : > { %s921_s20 = scalar_select %p698_p6, 1, 0 }
  0x10   : > { %p703_p8 = pnand %p387_p5, %p118_p7  ;;  %s627_s22 = smov [#allocation5]  }
  0x11   : > { %s133_s23 = sshll.u32 %s627_s22, 4  ;;  %s28_s25 = sadd.s32 1, %s621_s13  ;;  %s134_s23 = int_to_ptr.vmem [resolvable:$true] %s133_s23 }
  0x12   : > { %s922_s21 = scalar_select %p703_p8, 1, 0 }
  0x13   : > { %p412_p9 = pneg %p703_p8  ;;  %s481_s28 = scalar_lea.hbm %s912_s1, 2048 }
  0x14   : > { %p482_p12 = scmp.ne.s32.totalorder %s912_s1, %s481_s28  ;;  %p488_p5 = scmp.lt.u32.totalorder %s481_s28, %s912_s1 }
  0x15   : > { %p712_p11 = pnand %p412_p9, %p683_p1 }
  0x17   : > { %p483_p13 = pneg %p712_p11 }
  0x19   : > { %p484_p0 = pnand %p483_p13, %p482_p12 }
  0x1b   : > { %p485_p3 = pneg %p484_p0 }
  0x1d   : > { %p490_p7 = pnand %p488_p5, %p485_p3 }
  0x1f   : > { %493 = shalt.err (!%p490_p7)
}
  0x20   : > { %s494_s5 = scalar_lea.vmem %s134_s23, 2048  ;;  %p502_p1 = scmp.lt.s32.totalorder %s134_s23, %s134_s23 }
  0x21   : > { %p495_p9 = scmp.ne.s32.totalorder %s134_s23, %s494_s5  ;;  %p503_p4 = scmp.lt.s32.totalorder %s494_s5, %s494_s5 }
  0x23   : > { %p497_p10 = pnand %p495_p9, %p483_p13  ;;  %p504_p8 = por %p503_p4, %p502_p1 }
  0x25   : > { %p498_p6 = pneg %p497_p10 }
  0x27   : > { %p505_p2 = pnand %p504_p8, %p498_p6 }
  0x29   : > { %508 = shalt.err (!%p505_p2)
}
  0x2a   : > { %s628_s6 = smov 128   ;;  %s629_s7 = smov 8  }
  0x2b   : > { %415 = dma.hbm_to_vmem [thread:$0]  (!%p712_p11), %s912_s1, 2048, %s134_s23, [#allocation6], %s628_s6, %s628_s6, %s629_s7  }
  0x2c   : > { %p29_p1 = scmp.ge.s32.totalorder %s28_s25, 2  ;;  %s40_s16 = sadd.s32 1, %s613_s11 }
  0x2d   : > { %p47_p2 = scmp.ne.s32.totalorder %s613_s11, %s609_s10  ;;  %p48_p4 = scmp.eq.s32.totalorder %s625_s14, 0 }
  0x2e   : > { %s939_s25 = smov (%p29_p1, %s28_s25), 0  ;;  %p925_p8 = scmp.ne.s32.totalorder %s919_s18, 0 }
  0x2f   : > { %p742_p6 = por %p48_p4, %p47_p2  ;;  %s35_s26 = ssub.s32 %s621_s13, %s939_s25 }
  0x30   : > { %p748_p10 = por %p925_p8, %p47_p2  ;;  %p425_p12 = scmp.lt.s32.totalorder %s625_s14, 2 }
  0x31   : > { %p38_p11 = scmp.eq.s32.totalorder %s35_s26, 0  ;;  %s147_s23 = sand.u32 1, %s613_s11  }
  0x32   : > { %s390_s27 = sshll.u32 %s147_s23, 7  ;;  %s402_s29 = sshll.u32 %s621_s13, 11 }
  0x33   : > { %s757_s28 = scalar_select %p38_p11, %s613_s11, %s40_s16  }
  0x34   : > { %s763_s4 = scalar_lea.hbm %s911_s0, %s402_s29  ;;  %s151_s18 = scalar_lea.vmem [#allocation2], %s390_s27 }
  0x35   : > { %s160_s5 = sshll.u32 %s151_s18, 4  ;;  %p769_p13 = pnand %p425_p12, %p742_p6  ;;  %s765_s5 = int_to_ptr.vmem [resolvable:$true] %s160_s5 }
  0x36   : > { %s773_s15 = scalar_lea.sflag [#allocation3], %s147_s23  ;;  %s509_s16 = scalar_lea.hbm %s763_s4, 2048 }
  0x37   : > { %p510_p0 = scmp.ne.s32.totalorder %s763_s4, %s509_s16  ;;  %p511_p3 = pneg %p769_p13 }
  0x38   : > { %s514_s22 = scalar_lea.hbm %s911_s0, 4096  ;;  %p515_p9 = scmp.lt.u32.totalorder %s763_s4, %s911_s0 }
  0x39   : > { %p512_p5 = pnand %p511_p3, %p510_p0  ;;  %p516_p1 = scmp.lt.u32.totalorder %s514_s22, %s509_s16 }
  0x3a   : > { %p518_p4 = scmp.lt.u32.totalorder %s509_s16, %s763_s4 }
  0x3b   : > { %p513_p7 = pneg %p512_p5  ;;  %p517_p2 = por %p516_p1, %p515_p9 }
  0x3d   : > { %p519_p6 = por %p518_p4, %p517_p2 }
  0x3f   : > { %p520_p8 = pnand %p519_p6, %p513_p7 }
  0x41   : > { %523 = shalt.err (!%p520_p8)
}
  0x42   : > { %s524_s23 = scalar_lea.vmem %s765_s5, 2048  ;;  %s630_s3 = smov [#allocation2]  }
  0x43   : > { %p525_p12 = scmp.ne.s32.totalorder %s765_s5, %s524_s23  ;;  %s529_s18 = sshll.u32 %s630_s3, 4  ;;  %s530_s18 = int_to_ptr.vmem [resolvable:$false] %s529_s18 }
  0x44   : > { %s531_s26 = scalar_lea.vmem %s530_s18, 4096  ;;  %p532_p5 = scmp.lt.s32.totalorder %s765_s5, %s530_s18 }
  0x45   : > { %p527_p11 = pnand %p525_p12, %p511_p3  ;;  %p533_p9 = scmp.lt.s32.totalorder %s531_s26, %s524_s23 }
  0x47   : > { %p528_p0 = pneg %p527_p11  ;;  %p534_p1 = por %p533_p9, %p532_p5 }
  0x49   : > { %p535_p2 = pnand %p534_p1, %p528_p0 }
  0x4b   : > { %538 = shalt.err (!%p535_p2)
}
  0x4c   : > { %419 = dma.hbm_to_vmem [thread:$0]  (!%p769_p13), %s763_s4, 2048, %s765_s5, %s773_s15, %s628_s6, %s628_s6, %s629_s7  }
  0x4d   : > { %p928_p3 = scmp.ne.s32.totalorder %s922_s21, 0 }
  0x4e   : > { %s807_s16 = sand.u32 (!%p928_p3), 1, %s609_s10   ;;  %p929_p7 = scmp.ne.s32.totalorder (!%p928_p3), %s920_s19, 0 }
  0x4f   : > { %172 = sbr.rel (%p928_p3) target bundleno = 120 (0x78), region = 28  ;;  %s394_s27 = sshll.u32 (!%p928_p3), %s807_s16, 7 }
  0x50   : > { %s175_s22 = scalar_lea.sflag (!%p928_p3), [#allocation3], %s807_s16  ;;  %s811_s29 = scalar_lea.vmem (!%p928_p3), [#allocation2], %s394_s27 }
  0x56   : > { %592 = dma.done.wait (%p929_p7), %s175_s22, 2048  }
  0x57   : > { %594 = vsyncadd (%p929_p7), %s175_s22, 4294965248  ;;  %p930_p13 = scmp.ne.s32.totalorder %s918_s17, 0 }
  0x59   : > { %596 = dma.done.wait (%p930_p13), [#allocation6], 2048  }
  0x5a   : > { %598 = vsyncadd (%p930_p13), [#allocation6], 4294965248  ;;  %v206_v0 = vld [vmem:[%s811_s29] sm:$0xff]  ;;  %v207_v2 = vld [vmem:[%s811_s29 + $0x8] sm:$0xff]  ;;  %s826_s17 = scalar_lea.vmem [#allocation7], %s394_s27  ;;  %s403_s19 = sshll.u32 %s617_s12, 11 }
  0x5b   : > { %v222_v1 = vld [vmem:[#allocation5] sm:$0xff]  ;;  %v223_v4 = vld [vmem:[#allocation5 + $0x8] sm:$0xff]  ;;  %v208_v5 = vld [vmem:[%s811_s29 + $0x10] sm:$0xff]  ;;  %s286_s21 = sshll.u32 %s826_s17, 4  ;;  %s856_s7 = scalar_lea.hbm %s913_s2, %s403_s19  ;;  %s858_s21 = int_to_ptr.vmem [resolvable:$true] %s286_s21 }
  0x5c   : > { %v238_v3 = vadd.f32 %v222_v1, %v206_v0  ;;  %v224_v6 = vld [vmem:[#allocation5 + $0x10] sm:$0xff]  ;;  %v239_v7 = vadd.f32 %v223_v4, %v207_v2  ;;  %v209_v9 = vld [vmem:[%s811_s29 + $0x18] sm:$0xff]  ;;  %v210_v11 = vld [vmem:[%s811_s29 + $0x20] sm:$0xff]  ;;  %s271_s4 = scalar_lea.sflag [#allocation4], %s807_s16  ;;  %s539_s5 = scalar_lea.vmem %s858_s21, 2048 }
  0x5d   : > { %v240_v8 = vadd.f32 %v224_v6, %v208_v5  ;;  %v225_v10 = vld [vmem:[#allocation5 + $0x18] sm:$0xff]  ;;  %v226_v13 = vld [vmem:[#allocation5 + $0x20] sm:$0xff]  ;;  %v211_v14 = vld [vmem:[%s811_s29 + $0x28] sm:$0xff]  ;;  %p540_p4 = scmp.ne.s32.totalorder %s858_s21, %s539_s5  ;;  %s631_s8 = smov [#allocation7]  }
  0x5e   : > { %254 = vst [vmem:[%s826_s17] sm:$0xff] %v238_v3  ;;  %v241_v12 = vadd.f32 %v225_v10, %v209_v9  ;;  %v227_v15 = vld [vmem:[#allocation5 + $0x28] sm:$0xff]  ;;  %255 = vst [vmem:[%s826_s17 + $0x8] sm:$0xff] %v239_v7  ;;  %v242_v16 = vadd.f32 %v226_v13, %v210_v11  ;;  %v212_v18 = vld [vmem:[%s811_s29 + $0x30] sm:$0xff]  ;;  %s543_s15 = sshll.u32 %s631_s8, 4  ;;  %s544_s15 = int_to_ptr.vmem [resolvable:$false] %s543_s15 }
  0x5f   : > { %256 = vst [vmem:[%s826_s17 + $0x10] sm:$0xff] %v240_v8  ;;  %v243_v17 = vadd.f32 %v227_v15, %v211_v14  ;;  %v228_v19 = vld [vmem:[#allocation5 + $0x30] sm:$0xff]  ;;  %v213_v20 = vld [vmem:[%s811_s29 + $0x38] sm:$0xff]  ;;  %v214_v23 = vld [vmem:[%s811_s29 + $0x40] sm:$0xff]  ;;  %p541_p6 = pnand %p540_p4, %p748_p10  ;;  %s545_s30 = scalar_lea.vmem %s544_s15, 4096 }
  0x60   : > { %257 = vst [vmem:[%s826_s17 + $0x18] sm:$0xff] %v241_v12  ;;  %v244_v21 = vadd.f32 %v228_v19, %v212_v18  ;;  %v229_v22 = vld [vmem:[#allocation5 + $0x38] sm:$0xff]  ;;  %v230_v24 = vld [vmem:[#allocation5 + $0x40] sm:$0xff]  ;;  %258 = vst [vmem:[%s826_s17 + $0x20] sm:$0xff] %v242_v16  ;;  %p546_p12 = scmp.lt.s32.totalorder %s858_s21, %s544_s15  ;;  %p547_p11 = scmp.lt.s32.totalorder %s545_s30, %s539_s5 }
  0x61   : > { %259 = vst [vmem:[%s826_s17 + $0x28] sm:$0xff] %v243_v17  ;;  %v245_v25 = vadd.f32 %v229_v22, %v213_v20  ;;  %v246_v26 = vadd.f32 %v230_v24, %v214_v23  ;;  %v215_v27 = vld [vmem:[%s811_s29 + $0x48] sm:$0xff]  ;;  %v216_v29 = vld [vmem:[%s811_s29 + $0x50] sm:$0xff]  ;;  %v217_v32 = vld [vmem:[%s811_s29 + $0x58] sm:$0xff]  ;;  %p542_p8 = pneg %p541_p6 }
  0x62   : > { %v231_v28 = vld [vmem:[#allocation5 + $0x48] sm:$0xff]  ;;  %260 = vst [vmem:[%s826_s17 + $0x30] sm:$0xff] %v244_v21  ;;  %v232_v31 = vld [vmem:[#allocation5 + $0x50] sm:$0xff]  ;;  %v233_v33 = vld [vmem:[#allocation5 + $0x58] sm:$0xff]  ;;  %p548_p0 = por %p547_p11, %p546_p12 }
  0x63   : > { %v247_v30 = vadd.f32 %v231_v28, %v215_v27  ;;  %261 = vst [vmem:[%s826_s17 + $0x38] sm:$0xff] %v245_v25  ;;  %262 = vst [vmem:[%s826_s17 + $0x40] sm:$0xff] %v246_v26  ;;  %v248_v34 = vadd.f32 %v232_v31, %v216_v29  ;;  %v249_v35 = vadd.f32 %v233_v33, %v217_v32  ;;  %v218_v36 = vld [vmem:[%s811_s29 + $0x60] sm:$0xff]  ;;  %v219_v38 = vld [vmem:[%s811_s29 + $0x68] sm:$0xff] }
  0x64   : > { %v234_v37 = vld [vmem:[#allocation5 + $0x60] sm:$0xff]  ;;  %v235_v40 = vld [vmem:[#allocation5 + $0x68] sm:$0xff]  ;;  %v220_v41 = vld [vmem:[%s811_s29 + $0x70] sm:$0xff]  ;;  %p549_p5 = pnand %p548_p0, %p542_p8 }
  0x65   : > { %263 = vst [vmem:[%s826_s17 + $0x48] sm:$0xff] %v247_v30  ;;  %v250_v39 = vadd.f32 %v234_v37, %v218_v36  ;;  %v236_v42 = vld [vmem:[#allocation5 + $0x70] sm:$0xff]  ;;  %264 = vst [vmem:[%s826_s17 + $0x50] sm:$0xff] %v248_v34  ;;  %v251_v43 = vadd.f32 %v235_v40, %v219_v38  ;;  %v221_v45 = vld [vmem:[%s811_s29 + $0x78] sm:$0xff] }
  0x66   : > { %265 = vst [vmem:[%s826_s17 + $0x58] sm:$0xff] %v249_v35  ;;  %v252_v44 = vadd.f32 %v236_v42, %v220_v41  ;;  %v237_v46 = vld [vmem:[#allocation5 + $0x78] sm:$0xff] }
  0x67   : > { %266 = vst [vmem:[%s826_s17 + $0x60] sm:$0xff] %v250_v39  ;;  %v253_v47 = vadd.f32 %v237_v46, %v221_v45  ;;  %267 = vst [vmem:[%s826_s17 + $0x68] sm:$0xff] %v251_v43 }
  0x68   : > { %268 = vst [vmem:[%s826_s17 + $0x70] sm:$0xff] %v252_v44 }
  0x69   : > { %269 = vst [vmem:[%s826_s17 + $0x78] sm:$0xff] %v253_v47 }
  0x6a   : > { %552 = shalt.err (!%p549_p5)
}
  0x6b   : > { %s553_s23 = scalar_lea.hbm %s856_s7, 2048  ;;  %s557_s26 = scalar_lea.hbm %s913_s2, 4096 }
  0x6c   : > { %p554_p9 = scmp.ne.s32.totalorder %s856_s7, %s553_s23  ;;  %p558_p3 = scmp.lt.u32.totalorder %s856_s7, %s913_s2 }
  0x6d   : > { %p559_p7 = scmp.lt.u32.totalorder %s557_s26, %s553_s23  ;;  %p561_p4 = scmp.lt.u32.totalorder %s553_s23, %s856_s7 }
  0x6e   : > { %p555_p1 = pnand %p554_p9, %p748_p10 }
  0x6f   : > { %p560_p13 = por %p559_p7, %p558_p3 }
  0x70   : > { %p556_p2 = pneg %p555_p1 }
  0x71   : > { %p562_p6 = por %p561_p4, %p560_p13 }
  0x73   : > { %p563_p8 = pnand %p562_p6, %p556_p2 }
  0x75   : > { %566 = shalt.err (!%p563_p8)
}
  0x76   : > { %s632_s29 = smov 128   ;;  %s633_s17 = smov 8  }
  0x77   : > { %410 = dma.vmem_to_hbm [thread:$0]  (%p748_p10), %s858_s21, 2048, %s856_s7, %s271_s4, %s632_s29, %s632_s29, %s633_s17  }
  0x78 PF: > { %s301_s19 = sand.u32 1, %s605_s9   ;;  %p931_p12 = scmp.ne.s32.totalorder %s921_s20, 0 }
  0x79   : > { %p932_p11 = scmp.ge.s32.totalorder %s625_s14, 2  ;;  %s302_s12 = scalar_lea.sflag [#allocation4], %s301_s19 }
  0x7b   : > { %p421_p0 = pnand %p932_p11, %p931_p12 }
  0x7d   : > { %600 = dma.done.wait (!%p421_p0), %s302_s12, 2048  }
  0x7e   : > { %602 = vsyncadd (!%p421_p0), %s302_s12, 4294965248  ;;  %s19_s14 = sadd.s32 1, %s625_s14   ;;  %s933_s9 = smov %s609_s10 }
  0x7f   : > { %p16_p5 = scmp.ge.s32.totalorder %s19_s14, 4   ;;  %s934_s10 = smov %s613_s11 }
  0x80   : > { %s935_s11 = smov %s757_s28  ;;  %s936_s12 = smov %s621_s13 }
  0x81   : > { %s937_s13 = smov %s939_s25  ;;  %18 = sbr.rel (!%p16_p5) target bundleno = 7 (0x7), region = 78 }
  0x88   :  { %307 = vsyncpa [#allocation3], 1 }
  0x89   :  { %309 = vsyncpa [#allocation3 + $0x1], 1 }
  0x8a   :  { %310 = vsyncpa [#allocation6], 1 }
  0x8b   :  { %311 = vsyncpa [#allocation4], 1 }
  0x8c   :  { %313 = vsyncpa [#allocation4 + $0x1], 1 }

</bundles_post_ra>
